<compile_context>
chip_gen: v7x
topology: tpu7x:2x2x1
jax: 0.10.0
libtpu: 0.0.40
codegen_flags: <defaults>
</compile_context>

<pallas_src>
import functools

import jax
import jax.numpy as jnp
from jax.experimental import pallas as pl
from jax.experimental.pallas import tpu as pltpu

_EPS = 1e-12
_PAD = 8   # sublane tile: each of adv / img / txt gets its own 8-row segment


# -------------------------- Pallas kernel --------------------------------- #
def clip_embeds_loss_kernel(lhs_ref, rhs_ref, loss_ref, *, inv_n):
    """lhs_ref: [3*_PAD, K+H+1] f32 block-diagonal stacked inputs.
       rhs_ref: [K+H+1, D]      f32 fused [W_vis_adj; W_tproj; b_vis].
       loss_ref: [1, 1]         f32 scalar output (SMEM)."""
    # Single MXU matmul covers adv-vision, target-vision and text projections
    # (bias folded in via the trailing 1-column of the vision rows).
    e = jnp.dot(lhs_ref[...], rhs_ref[...],
                preferred_element_type=jnp.float32)                 # [3*_PAD, D]

    # One L2-normalization pass for all three segments (EUP rsqrt; zero rows -> 0).
    e = e * jax.lax.rsqrt(jnp.sum(e * e, axis=-1, keepdims=True) + _EPS)

    # Sublane-aligned views (offsets are multiples of 8 -> no relayout).
    adv = e[0:_PAD]
    img = e[_PAD:2 * _PAD]
    txt = e[2 * _PAD:3 * _PAD]

    d_img = adv - img
    d_txt = adv - txt
    # Single scalar reduction for both MSE(sum) terms; padded rows contribute 0.
    total = jnp.sum(d_img * d_img + d_txt * d_txt)
    loss_ref[0, 0] = total * inv_n        # reduction='mean' over (B_img + B_txt)


# -------------------------- one-time param prep ---------------------------- #
def prepare_clip_params(params, *, patch=4):
    """Hoisted out of the per-call hot path: fuse patch-embed @ visual-proj,
    fold the (x - mean)/std pixel normalization into the weight + a bias row,
    and stack [W_vis_adj; W_tproj; b_vis] into the single kernel rhs."""
    K, _ = params["w_patch"].shape
    H, D = params["w_tproj"].shape
    pp = patch * patch

    w_vis = params["w_patch"] @ params["w_vproj"]                    # [K, D]
    mean_k = jnp.repeat(params["pix_mean"], pp)                      # [K]  (k = (c,ph,pw))
    std_k = jnp.repeat(params["pix_std"], pp)                        # [K]
    w_vis_adj = w_vis / std_k[:, None]                               # [K, D]
    b_vis = (-(mean_k / std_k) @ w_vis).reshape(1, -1)               # [1, D]

    rhs = jnp.concatenate(
        [w_vis_adj, params["w_tproj"], b_vis], axis=0).astype(jnp.float32)   # [K+H+1, D]
    return {"rhs": rhs, "tok_table": params["tok_table"],
            "K": int(K), "H": int(H), "patch": int(patch)}


# -------------------------- wrapper / glue --------------------------------- #
def _pooled_patches(x_nchw, patch):
    """Mean over all patches of the (C, ph, pw)-flattened unfold, computed as a
    strided spatial average — never materializes the [B, P, C*p*p] tensor."""
    B, C, H, W = x_nchw.shape
    gh, gw = H // patch, W // patch
    x = x_nchw.reshape(B, C, gh, patch, gw, patch)
    return jnp.mean(x, axis=(2, 4)).reshape(B, C * patch * patch)    # [B, K]


def clip_embeds_loss(adv_image, images, token_ids, prepared):
    """adv_image, images: [B, C, H, W] f32 (NCHW). token_ids: [B, S] int32.
    prepared: output of prepare_clip_params (fused weights, token table)."""
    patch, K, H = prepared["patch"], prepared["K"], prepared["H"]
    B = adv_image.shape[0]
    assert B <= _PAD, "pad segments are 8 rows; tile B across a grid for larger batch"
    Kt = K + H + 1

    pooled_adv = _pooled_patches(adv_image, patch).astype(jnp.float32)   # [B, K]
    pooled_img = _pooled_patches(images, patch).astype(jnp.float32)      # [B, K]
    pooled_txt = jnp.mean(jnp.take(prepared["tok_table"], token_ids, axis=0),
                          axis=1).astype(jnp.float32)                    # [B, H]

    # Block-diagonal lhs, each segment padded to an 8-row sublane tile:
    #   rows [0, 8)   : [pooled_adv, 0_H, 1]
    #   rows [8, 16)  : [pooled_img, 0_H, 1]
    #   rows [16, 24) : [0_K, pooled_txt, 0]
    lhs = jnp.zeros((3 * _PAD, Kt), jnp.float32)
    lhs = lhs.at[0:B, 0:K].set(pooled_adv)
    lhs = lhs.at[0:B, K + H].set(1.0)
    lhs = lhs.at[_PAD:_PAD + B, 0:K].set(pooled_img)
    lhs = lhs.at[_PAD:_PAD + B, K + H].set(1.0)
    lhs = lhs.at[2 * _PAD:2 * _PAD + B, K:K + H].set(pooled_txt)

    kernel = functools.partial(clip_embeds_loss_kernel, inv_n=1.0 / (2 * B))
    out = pl.pallas_call(
        kernel,
        out_shape=jax.ShapeDtypeStruct((1, 1), jnp.float32),
        in_specs=[pl.BlockSpec(memory_space=pltpu.MemorySpace.VMEM)] * 2,
        out_specs=pl.BlockSpec(memory_space=pltpu.MemorySpace.SMEM),
    )(lhs, prepared["rhs"])
    return out[0, 0]


# -------------------------- reference (plain JAX) -------------------------- #
def _extract_patches(x_nchw, patch):
    B, C, H, W = x_nchw.shape
    gh, gw = H // patch, W // patch
    x = x_nchw.reshape(B, C, gh, patch, gw, patch)
    x = jnp.transpose(x, (0, 2, 4, 1, 3, 5))            # [B, gh, gw, C, p, p]
    return x.reshape(B, gh * gw, C * patch * patch)


def _reference(adv_image, images, token_ids, params, *, patch=4):
    mean = params["pix_mean"].reshape(1, -1, 1, 1)
    std = params["pix_std"].reshape(1, -1, 1, 1)

    def vembed(x):
        p = _extract_patches((x - mean) / std, patch)
        pooled = jnp.mean(p, axis=1)
        e = pooled @ params["w_patch"] @ params["w_vproj"]
        return e / jnp.linalg.norm(e, axis=-1, keepdims=True)

    adv_e = vembed(adv_image)
    img_e = vembed(images)
    t = jnp.mean(jnp.take(params["tok_table"], token_ids, axis=0), axis=1)
    txt_e = t @ params["w_tproj"]
    txt_e = txt_e / jnp.linalg.norm(txt_e, axis=-1, keepdims=True)
    total = jnp.sum((adv_e - img_e) ** 2) + jnp.sum((adv_e - txt_e) ** 2)
    return total / (img_e.shape[0] + txt_e.shape[0])


# ------------------------------ main ---------------------------------------- #
if __name__ == "__main__":
    B, C, IMG, PATCH = 2, 3, 16, 4
    SEQ, HID, DIM, VOCAB = 8, 32, 32, 64
    K = C * PATCH * PATCH

    key = jax.random.PRNGKey(0)
    k = iter(jax.random.split(key, 8))

    params = {
        "pix_mean": jnp.array([0.481, 0.458, 0.408], jnp.float32),
        "pix_std": jnp.array([0.269, 0.261, 0.276], jnp.float32),
        "w_patch": jax.random.normal(next(k), (K, HID), jnp.float32) * 0.05,
        "w_vproj": jax.random.normal(next(k), (HID, DIM), jnp.float32) * 0.05,
        "w_tproj": jax.random.normal(next(k), (HID, DIM), jnp.float32) * 0.05,
        "tok_table": jax.random.normal(next(k), (VOCAB, HID), jnp.float32) * 0.02,
    }

    adv_image = jax.random.uniform(next(k), (B, C, IMG, IMG), jnp.float32)
    images = jax.random.uniform(next(k), (B, C, IMG, IMG), jnp.float32)
    token_ids = jax.random.randint(next(k), (B, SEQ), 0, VOCAB, jnp.int32)

    prepared = prepare_clip_params(params, patch=PATCH)   # one-time weight fusion

    loss = jax.block_until_ready(
        clip_embeds_loss(adv_image, images, token_ids, prepared))
    ref = _reference(adv_image, images, token_ids, params, patch=PATCH)

    assert jnp.isfinite(loss), "non-finite loss"
    assert jnp.allclose(loss, ref, rtol=1e-4, atol=1e-5), (loss, ref)
    print("KERNEL_OK")
</pallas_src>

<mosaic_0001>
module attributes {stable_mosaic.version = 11 : i64} {
  func.func @clip_embeds_loss_kernel(%arg0: memref<24x81xf32, #tpu.memory_space<vmem>>, %arg1: memref<81x32xf32, #tpu.memory_space<vmem>>, %arg2: memref<1x1xf32, #tpu.memory_space<smem>>) attributes {dimension_semantics = [], scalar_prefetch = 0 : i64, scratch_operands = 0 : i64, tpu.core_type = #tpu.core_type<tc>} {
    %c0 = arith.constant 0 : index
    %c0_0 = arith.constant 0 : index
    %0 = vector.load %arg0[%c0, %c0_0] : memref<24x81xf32, #tpu.memory_space<vmem>>, vector<24x81xf32>
    %c0_1 = arith.constant 0 : index
    %c0_2 = arith.constant 0 : index
    %1 = vector.load %arg1[%c0_1, %c0_2] : memref<81x32xf32, #tpu.memory_space<vmem>>, vector<81x32xf32>
    %cst = arith.constant dense<0.000000e+00> : vector<24x32xf32>
    %2 = tpu.matmul %0, %1, %cst {dimension_numbers = #tpu.dot_dimension_numbers<[1], [0], [0], [1], [0, 0, 1, 1], [], []>} : vector<24x81xf32>, vector<81x32xf32>, vector<24x32xf32> -> vector<24x32xf32>
    %3 = arith.mulf %2, %2 : vector<24x32xf32>
    %cst_3 = arith.constant dense<0.000000e+00> : vector<24xf32>
    %4 = vector.multi_reduction <add>, %3, %cst_3 [1] : vector<24x32xf32> to vector<24xf32>
    %5 = vector.shape_cast %4 : vector<24xf32> to vector<24x1xf32>
    %cst_4 = arith.constant 9.99999996E-13 : f32
    %6 = vector.broadcast %cst_4 : f32 to vector<24x1xf32>
    %7 = arith.addf %5, %6 : vector<24x1xf32>
    %8 = math.rsqrt %7 : vector<24x1xf32>
    %9 = vector.broadcast %8 : vector<24x1xf32> to vector<24x32xf32>
    %10 = arith.mulf %2, %9 : vector<24x32xf32>
    %11 = vector.extract_strided_slice %10 {offsets = [0, 0], sizes = [8, 32], strides = [1, 1]} : vector<24x32xf32> to vector<8x32xf32>
    %12 = vector.extract_strided_slice %10 {offsets = [8, 0], sizes = [8, 32], strides = [1, 1]} : vector<24x32xf32> to vector<8x32xf32>
    %13 = vector.extract_strided_slice %10 {offsets = [16, 0], sizes = [8, 32], strides = [1, 1]} : vector<24x32xf32> to vector<8x32xf32>
    %14 = arith.subf %11, %12 : vector<8x32xf32>
    %15 = arith.subf %11, %13 : vector<8x32xf32>
    %16 = arith.mulf %14, %14 : vector<8x32xf32>
    %17 = arith.mulf %15, %15 : vector<8x32xf32>
    %18 = arith.addf %16, %17 : vector<8x32xf32>
    %19 = vector.shape_cast %18 : vector<8x32xf32> to vector<1x8x32xf32>
    %cst_5 = arith.constant dense<0.000000e+00> : vector<1xf32>
    %20 = vector.multi_reduction <add>, %19, %cst_5 [1, 2] : vector<1x8x32xf32> to vector<1xf32>
    %21 = vector.shape_cast %20 : vector<1xf32> to vector<1x1x1xf32>
    %22 = vector.extract %21[0, 0, 0] : f32 from vector<1x1x1xf32>
    %cst_6 = arith.constant 2.500000e-01 : f32
    %23 = arith.mulf %22, %cst_6 : f32
    %c0_7 = arith.constant 0 : index
    %c0_8 = arith.constant 0 : index
    %24 = memref.load %arg2[%c0_7, %c0_8] : memref<1x1xf32, #tpu.memory_space<smem>>
    memref.store %23, %arg2[%c0_7, %c0_8] : memref<1x1xf32, #tpu.memory_space<smem>>
    return
  }
}

</mosaic_0001>

<bundles_post_ra>
// kernel: tpu_custom_call.1
= control target key start
LH: loop header
LB: loop body
LE: loop exit
PB: predicated region body
PF: predicated region fallthrough
CT: control target
= control target key end

     0   :  { %v273_v3 = vmov 0.0|0.0   ;;  %vm274_vm0 = vmmov 0   ;;  %v275_v6 = vmov 0.0   ;;  %s353_s0 = inlined_call_operand.vmem [shape: f32[24,81], index: 0, kind: input, shape index: {}]   ;;  %s354_s1 = inlined_call_operand.vmem [shape: f32[81,32], index: 1, kind: input, shape index: {}]   ;;  %s355_s2 = inlined_call_operand.hbm [shape: f32[1,1], index: 2, kind: output, shape index: {}]  }
   0x1   :  { %v15_v0 = vld [vmem:[%s354_s1] sm:$0xff]  ;;  %v16_v1 = vld [vmem:[%s354_s1 + $0x8] sm:$0xff]  ;;  %v17_v2 = vld [vmem:[%s354_s1 + $0x10] sm:$0xff]  ;;  %222 = vmatprep.subr.bf16.mxu0 %v273_v3  ;;  %237 = vmatprep.subr.bf16.mxu1 %v273_v3 }
   0x2   :  { %v223_v4 = vpack.c.bf16 %v16_v1, %v15_v0  ;;  %v18_v5 = vld [vmem:[%s354_s1 + $0x18] sm:$0xff]  ;;  %213 = vmatprep.mubr.msk.f32.mxu0 %vm274_vm0, %v275_v6  ;;  %216 = vmatprep.mubr.msk.f32.mxu1 %vm274_vm0, %v275_v6  ;;  %v19_v8 = vld [vmem:[%s354_s1 + $0x20] sm:$0xff]  ;;  %v20_v9 = vld [vmem:[%s354_s1 + $0x28] sm:$0xff] }
   0x3   :  { %v226_v7 = vpack.c.bf16 %v18_v5, %v17_v2 }
   0x4   :  { %224 = vmatpush3.bf16.msra.mxu0 %v223_v4  ;;  %243 = vmatpush3.bf16.msra.mxu1 %v223_v4 }
   0x5   :  { %225 = vmatprep.subr.bf16.mxu0 %v273_v3  ;;  %238 = vmatprep.subr.bf16.mxu1 %v273_v3 }
   0x6   :  { %7 = vsyncpa [#allocation3], 0  ;;  %v229_v10 = vpack.c.bf16 %v20_v9, %v19_v8  ;;  %v21_v11 = vld [vmem:[%s354_s1 + $0x30] sm:$0xff]  ;;  %v22_v12 = vld [vmem:[%s354_s1 + $0x38] sm:$0xff]  ;;  %vm36_vm1 = vcmask 1040384   ;;  %vm26_vm2 = vcmask 662528  }
   0x7   :  { %v232_v13 = vpack.c.bf16 %v22_v12, %v21_v11  ;;  %v23_v14 = vld [vmem:[%s354_s1 + $0x40] sm:$0xff]  ;;  %v24_v15 = vld [vmem:[%s354_s1 + $0x48] sm:$0xff]  ;;  %v25_v17 = vld [vmem:[%s354_s1 + $0x50] sm:$0x1]  ;;  %vm123_vm3 = vcmask 261120   ;;  %s261_s11 = scalar_lea.hbm %s355_s2, 16 }
   0x8   :  { %227 = vmatpush3.bf16.msra.mxu0 %v226_v7  ;;  %244 = vmatpush3.bf16.msra.mxu1 %v226_v7  ;;  %v235_v16 = vpack.c.bf16 %v24_v15, %v23_v14  ;;  %v12_v18 = vld [vmem:[%s353_s0] sm:$0xff]  ;;  %v13_v19 = vld [vmem:[%s353_s0 + $0x8] sm:$0xff]  ;;  %v14_v20 = vld [vmem:[%s353_s0 + $0x10] sm:$0xff]  ;;  %p262_p0 = scmp.ne.s32.totalorder %s355_s2, %s261_s11  ;;  %p265_p1 = scmp.lt.u32.totalorder %s261_s11, %s355_s2 }
   0x9   :  { %228 = vmatprep.subr.bf16.mxu0 %v273_v3  ;;  %239 = vmatprep.subr.bf16.mxu1 %v273_v3 }
   0xa   :  { %p267_p2 = pnand %p265_p1, %p262_p0 }
   0xc   :  { %230 = vmatpush3.bf16.msra.mxu0 %v229_v10  ;;  %245 = vmatpush3.bf16.msra.mxu1 %v229_v10 }
   0xd   :  { %231 = vmatprep.subr.bf16.mxu0 %v273_v3  ;;  %240 = vmatprep.subr.bf16.mxu1 %v273_v3 }
  0x10   :  { %233 = vmatpush3.bf16.msra.mxu0 %v232_v13  ;;  %246 = vmatpush3.bf16.msra.mxu1 %v232_v13 }
  0x11   :  { %234 = vmatprep.subr.bf16.mxu0 %v273_v3  ;;  %241 = vmatprep.subr.bf16.mxu1 %v273_v3 }
  0x14   :  { %236 = vmatpush3.bf16.msra.mxu0 %v235_v16  ;;  %247 = vmatpush3.bf16.msra.mxu1 %v235_v16 }
  0x15   :  { %211 = vmatprep.subr.mxu0 %v275_v6  ;;  %242 = vmatprep.subr.mxu1 %v275_v6 }
  0x18   :  { %212 = vmatpush3.msk.msra.mxu0 %vm36_vm1, %v25_v17  ;;  %248 = vmatpush3.msk.msra.mxu1 %vm36_vm1, %v25_v17 }
  0x19   :  { %214 = vmatmul.mubr.msk.f32.vlgmr.msra.gmra.mrb[0].mxu0 %vm26_vm2, %v12_v18  ;;  %217 = vmatmul.mubr.msk.f32.vlgmr.msra.gmra.mrb[0].mxu1 %vm26_vm2, %v13_v19 }
  0x1a   :  { %219 = vmatprep.mubr.msk.f32.mxu1 %vm274_vm0, %v275_v6 }
  0x1d   :  { %220 = vmatmul.mubr.msk.f32.gmra.mrb[2].mxu1 %vm26_vm2, %v14_v20 }
  0xec   :  { %v106_v21 = vpop.f32.mrb[0].mxu0  ;;  %v111_v22 = vpop.f32.mrb[0].mxu1 }
  0xed   :  { %v215_v23 = vpop.f32.mrb[1].mxu0  ;;  %v218_v24 = vpop.f32.mrb[1].mxu1  ;;  %v120_v25 = vmul.f32 %v106_v21, %v106_v21  ;;  %v121_v26 = vmul.f32 %v111_v22, %v111_v22 }
  0xef   :  { %v124_v27 = vsel %vm123_vm3, %v120_v25, 0.0  ;;  %v127_v32 = vsel %vm123_vm3, %v121_v26, 0.0 }
  0xf0   :  { %v116_v28 = vpop.f32.mrb[2].mxu1  ;;  %125 = vadd.xlane.f32.xlu0 %v124_v27 }
  0xf1   :  { %v221_v29 = vpop.f32.mrb[3].mxu1  ;;  %v122_v30 = vmul.f32 %v116_v28, %v116_v28 }
  0xf3   :  { %v130_v31 = vsel %vm123_vm3, %v122_v30, 0.0 }
  0xf4   :  { %131 = vadd.xlane.f32.xlu1 %v130_v31  ;;  %128 = vadd.xlane.f32.xlu0 %v127_v32 }
 0x17d   :  { %v126_v33 = vpop.xlane.xlu0 %125 }
 0x17e   :  { %v133_v34 = vadd.f32 1e-12, %v126_v33 }
 0x180   :  { %255 = vrsqrt.f32 %v133_v34 }
 0x181   :  { %v132_v35 = vpop.xlane.xlu1 %131  ;;  %v129_v36 = vpop.xlane.xlu0 %128 }
 0x182   :  { %v135_v37 = vadd.f32 1e-12, %v132_v35  ;;  %v134_v38 = vadd.f32 1e-12, %v129_v36 }
 0x184   :  { %257 = vrsqrt.f32 %v135_v37 }
 0x185   :  { %259 = vrsqrt.f32 %v134_v38 }
 0x18a   :  { %v256_v39 = vpop.eup %255 }
 0x18b   :  { %v139_v42 = vmul.f32 %v256_v39, %v106_v21 }
 0x18e   :  { %v258_v40 = vpop.eup %257 }
 0x18f   :  { %v260_v41 = vpop.eup %259  ;;  %v141_v43 = vmul.f32 %v258_v40, %v116_v28 }
 0x190   :  { %v140_v44 = vmul.f32 %v260_v41, %v111_v22 }
 0x191   :  { %v143_v45 = vsub.f32 %v139_v42, %v141_v43 }
 0x192   :  { %v142_v46 = vsub.f32 %v139_v42, %v140_v44 }
 0x193   :  { %v145_v47 = vmul.f32 %v143_v45, %v143_v45 }
 0x194   :  { %v144_v48 = vmul.f32 %v142_v46, %v142_v46 }
 0x196   :  { %v146_v49 = vadd.f32 %v145_v47, %v144_v48 }
 0x198   :  { %v147_v50 = vsel %vm123_vm3, %v146_v49, 0.0 }
 0x199   :  { %148 = vadd.xlane.f32.xlu1 %v147_v50 }
 0x226   :  { %v149_v51 = vpop.xlane.xlu1 %148 }
 0x227   :  { %v150_v52 = vrot.slane %v149_v51, 4 }
 0x229   :  { %v151_v53 = vadd.f32 %v150_v52, %v149_v51 }
 0x22b   :  { %v152_v54 = vrot.slane %v151_v53, 2 }
 0x22d   :  { %v153_v55 = vadd.f32 %v152_v54, %v151_v53 }
 0x22f   :  { %v154_v56 = vrot.slane %v153_v55, 1 }
 0x231   :  { %v155_v57 = vadd.f32 %v154_v56, %v153_v55 }
 0x233   :  { %249 = vpush %v155_v57 }
 0x264   :  { %s250_s0 = spop %249 }
 0x265   :  { %s157_s1 = smul.f32 0.25, %s250_s0 }
 0x267   :  { %159 = sst [smem:[#allocation2]] %s157_s1 }
 0x268   :  { %270 = shalt.err (!%p267_p2)
}
 0x269   :  { %s276_s16 = smov [#allocation2]  }
 0x26a   :  { %167 = dma.smem_to_hbm %s276_s16, 16, %s355_s2, [#allocation3]  }
 0x26b   :  { %271 = dma.done.wait [#allocation3], 16  }
 0x26c   :  { %272 = vsyncadd [#allocation3], 4294967280 }
 0x26d   :  { %171 = sfence }
 0x26e   :  { %172 = vsyncpa [#allocation3], 1 }

</bundles_post_ra>
